<compile_context>
chip_gen: v7x
topology: tpu7x:2x2x1
jax: 0.10.0
libtpu: 0.0.40
codegen_flags: <defaults>
</compile_context>

<pallas_src>
import functools

import numpy as np
import jax
import jax.numpy as jnp
from jax import lax
from jax.experimental import pallas as pl
from jax.experimental.pallas import tpu as pltpu

_LANE = 128
_SUB = 8
# Largest element count that takes the grid-free single-block path.
# 4 inputs x 256K f32 = 4 MiB of VMEM (+ temps), safe on every generation's
# default scoped-VMEM budget and far beyond any realistic DPO batch.
_FAST_PATH_MAX_ELEMS = 1 << 18


def _neg_logsigmoid(x):
    # -logsigmoid(x) = log1p(exp(-|x|)) - min(x, 0)   (numerically stable)
    return jnp.log1p(jnp.exp(-jnp.abs(x))) - jnp.minimum(x, 0.0)


# --------------------------------------------------------------------------
# Fast path: one grid-free invocation, whole arrays as a single block.
# --------------------------------------------------------------------------
def _dpo_single_kernel(pc_ref, pr_ref, rc_ref, rr_ref, out_ref, *, beta):
    pc = pc_ref[...].astype(jnp.float32)
    pr = pr_ref[...].astype(jnp.float32)
    rc = rc_ref[...].astype(jnp.float32)
    rr = rr_ref[...].astype(jnp.float32)

    chosen = pc - rc
    rejected = pr - rr
    loss = _neg_logsigmoid(beta * (chosen - rejected))

    ls = jnp.sum(loss)
    cs = jnp.sum(chosen)
    rs = jnp.sum(rejected)

    lane = lax.broadcasted_iota(jnp.int32, out_ref.shape, 1)
    out_ref[...] = (jnp.where(lane == 0, ls, 0.0)
                    + jnp.where(lane == 1, cs, 0.0)
                    + jnp.where(lane == 2, rs, 0.0))


# --------------------------------------------------------------------------
# Tiled path: streaming reduction with resident (8,128) partial sums.
# --------------------------------------------------------------------------
def _dpo_tiled_kernel(pc_ref, pr_ref, rc_ref, rr_ref,
                      loss_out, chosen_out, rej_out, *, beta, total, tb):
    k = pl.program_id(1)

    @pl.when(k == 0)
    def _():
        loss_out[...] = jnp.zeros_like(loss_out)
        chosen_out[...] = jnp.zeros_like(chosen_out)
        rej_out[...] = jnp.zeros_like(rej_out)

    pc = pc_ref[...].astype(jnp.float32)      # (1, TB, 128)
    pr = pr_ref[...].astype(jnp.float32)
    rc = rc_ref[...].astype(jnp.float32)
    rr = rr_ref[...].astype(jnp.float32)

    chosen = pc - rc
    rejected = pr - rr
    loss = _neg_logsigmoid(beta * (chosen - rejected))

    block_elems = tb * _LANE
    base = (pl.program_id(0) * pl.num_programs(1) + k) * block_elems

    def _fold(x):
        # (1, TB, 128) -> (8, 128) vector partial sums.  Layout-preserving
        # reshape (TB multiple of 8) + axis-0 sum = pure aligned VPU adds.
        return jnp.sum(x.reshape(tb // _SUB, _SUB, _LANE), axis=0)

    is_full = base + block_elems <= total                       # no masking needed
    is_tail = jnp.logical_and(base < total, jnp.logical_not(is_full))

    @pl.when(is_full)
    def _():
        loss_out[...] += _fold(loss)
        chosen_out[...] += _fold(chosen)
        rej_out[...] += _fold(rejected)

    @pl.when(is_tail)
    def _():
        # Only the (at most one per slice) block straddling `total` pays for
        # the index mask.  Zero-padded chosen/rejected already contribute 0.
        row = lax.broadcasted_iota(jnp.int32, loss.shape, 1)
        lane = lax.broadcasted_iota(jnp.int32, loss.shape, 2)
        in_bounds = base + row * _LANE + lane < total
        loss_out[...] += _fold(jnp.where(in_bounds, loss, 0.0))
        chosen_out[...] += _fold(chosen)
        rej_out[...] += _fold(rejected)
    # Blocks entirely past `total` (pure padding) skip accumulation.


def _tpu_defaults():
    """Generation-aware (block_rows, parallel_slices) defaults."""
    try:
        kind = jax.devices()[0].device_kind.lower()
    except Exception:
        kind = ""
    if "v5" in kind:
        return 2048, 1      # 16 MiB default scoped VMEM, single TensorCore
    if "v6" in kind:
        return 4096, 1      # 32 MiB scoped VMEM, single TensorCore
    if "v7" in kind or "7x" in kind:
        return 4096, 2      # 32 MiB scoped VMEM, two TensorCores per chip
    return 2048, 1          # conservative fallback


def dpo_loss_pallas(policy_chosen_logps, policy_rejected_logps,
                    reference_chosen_logps, reference_rejected_logps,
                    *, beta=0.1, block_rows=None, num_parallel=None,
                    force_tiled=False):
    pc = jnp.asarray(policy_chosen_logps)
    pr = jnp.asarray(policy_rejected_logps)
    rc = jnp.asarray(reference_chosen_logps)
    rr = jnp.asarray(reference_rejected_logps)

    total = int(np.prod(pc.shape)) if pc.shape else 1
    inv_total = 1.0 / float(total)

    # ---------------- Fast path: single block, no padding, no copies -------
    if total <= _FAST_PATH_MAX_ELEMS and not force_tiled:
        def _flat2d(x):
            return x.reshape(1, total)

        out = pl.pallas_call(
            functools.partial(_dpo_single_kernel, beta=float(beta)),
            out_shape=jax.ShapeDtypeStruct((_SUB, _LANE), jnp.float32),
        )(_flat2d(pc), _flat2d(pr), _flat2d(rc), _flat2d(rr))

        return (out[0, 0] * inv_total,
                out[0, 1] * inv_total,
                out[0, 2] * inv_total)

    # ---------------- Tiled streaming path ---------------------------------
    tb_default, p_default = _tpu_defaults()
    tb_target = int(block_rows) if block_rows is not None else tb_default
    P = int(num_parallel) if num_parallel is not None else p_default

    rows = pl.cdiv(total, _LANE)
    P = max(1, min(P, pl.cdiv(rows, 16)))            # keep slices non-trivial
    rows_per_p = pl.cdiv(rows, P)                    # balanced split
    TB = max(16, min(tb_target, pl.cdiv(rows_per_p, 16) * 16))
    TB = (TB // 16) * 16                             # multiple of 16 (f32/bf16)
    k_steps = pl.cdiv(rows_per_p, TB)
    rows_per_p = k_steps * TB
    padded_total = P * rows_per_p * _LANE

    def _prep(x):
        # Keep the native HBM dtype (kernel upcasts in VMEM); pad only the
        # minimal rectangular tail needed for a (P, rows_per_p, 128) view.
        # TODO(synk): a memory_space=pl.ANY + manual-DMA ragged tail would
        # avoid even this single pad copy.
        flat = x.reshape(-1)
        if padded_total != total:
            flat = jnp.pad(flat, (0, padded_total - total))
        return flat.reshape(P, rows_per_p, _LANE)

    in_spec = pl.BlockSpec((1, TB, _LANE), lambda p, k: (p, k, 0))
    out_spec = pl.BlockSpec((1, _SUB, _LANE), lambda p, k: (p, 0, 0))
    out_sds = jax.ShapeDtypeStruct((P, _SUB, _LANE), jnp.float32)

    kernel = functools.partial(_dpo_tiled_kernel, beta=float(beta),
                               total=total, tb=TB)

    loss_p, chosen_p, rej_p = pl.pallas_call(
        kernel,
        out_shape=(out_sds, out_sds, out_sds),
        grid=(P, k_steps),
        in_specs=[in_spec, in_spec, in_spec, in_spec],
        out_specs=(out_spec, out_spec, out_spec),
        compiler_params=pltpu.CompilerParams(
            dimension_semantics=("parallel", "arbitrary")),
    )(_prep(pc), _prep(pr), _prep(rc), _prep(rr))

    return (jnp.sum(loss_p) * inv_total,
            jnp.sum(chosen_p) * inv_total,
            jnp.sum(rej_p) * inv_total)


def _numpy_reference(pc, pr, rc, rr, beta):
    pc, pr, rc, rr = (np.asarray(x, np.float64) for x in (pc, pr, rc, rr))
    logits = (pc - pr) - (rc - rr)
    x = beta * logits
    loss = np.log1p(np.exp(-np.abs(x))) - np.minimum(x, 0.0)   # -logsigmoid
    return loss.mean(), (pc - rc).mean(), (pr - rr).mean()


if __name__ == "__main__":
    beta = 0.1           # DPOLoss(beta=0.1)
    batch = 256          # per-sequence log-probs, shape (batch,)

    key = jax.random.PRNGKey(0)
    k1, k2, k3, k4 = jax.random.split(key, 4)
    policy_chosen = jax.random.normal(k1, (batch,), jnp.float32) - 5.0
    policy_rejected = jax.random.normal(k2, (batch,), jnp.float32) - 6.0
    reference_chosen = jax.random.normal(k3, (batch,), jnp.float32) - 5.5
    reference_rejected = jax.random.normal(k4, (batch,), jnp.float32) - 5.5

    # ---- Fast path (the realistic DPO case) --------------------------------
    dpo_jit = jax.jit(lambda a, b, c, d: dpo_loss_pallas(a, b, c, d, beta=beta))
    loss, chosen, rejected = dpo_jit(policy_chosen, policy_rejected,
                                     reference_chosen, reference_rejected)
    jax.block_until_ready((loss, chosen, rejected))

    ref = _numpy_reference(policy_chosen, policy_rejected,
                           reference_chosen, reference_rejected, beta)
    np.testing.assert_allclose(np.asarray(loss), ref[0], rtol=1e-4, atol=1e-5)
    np.testing.assert_allclose(np.asarray(chosen), ref[1], rtol=1e-4, atol=1e-5)
    np.testing.assert_allclose(np.asarray(rejected), ref[2], rtol=1e-4, atol=1e-5)

    # ---- Tiled streaming path (forced, non-multiple-of-128 size) -----------
    batch2 = 2050
    k5, k6, k7, k8 = jax.random.split(jax.random.PRNGKey(1), 4)
    pc2 = jax.random.normal(k5, (batch2,), jnp.float32) - 5.0
    pr2 = jax.random.normal(k6, (batch2,), jnp.float32) - 6.0
    rc2 = jax.random.normal(k7, (batch2,), jnp.float32) - 5.5
    rr2 = jax.random.normal(k8, (batch2,), jnp.float32) - 5.5

    dpo_tiled_jit = jax.jit(
        lambda a, b, c, d: dpo_loss_pallas(a, b, c, d, beta=beta,
                                           force_tiled=True, block_rows=16))
    loss2, chosen2, rejected2 = dpo_tiled_jit(pc2, pr2, rc2, rr2)
    jax.block_until_ready((loss2, chosen2, rejected2))

    ref2 = _numpy_reference(pc2, pr2, rc2, rr2, beta)
    np.testing.assert_allclose(np.asarray(loss2), ref2[0], rtol=1e-4, atol=1e-5)
    np.testing.assert_allclose(np.asarray(chosen2), ref2[1], rtol=1e-4, atol=1e-5)
    np.testing.assert_allclose(np.asarray(rejected2), ref2[2], rtol=1e-4, atol=1e-5)

    print("KERNEL_OK")
</pallas_src>

<mosaic_0001>
module attributes {stable_mosaic.version = 11 : i64} {
  func.func @_dpo_single_kernel(%arg0: memref<1x256xf32, #tpu.memory_space<vmem>>, %arg1: memref<1x256xf32, #tpu.memory_space<vmem>>, %arg2: memref<1x256xf32, #tpu.memory_space<vmem>>, %arg3: memref<1x256xf32, #tpu.memory_space<vmem>>, %arg4: memref<8x128xf32, #tpu.memory_space<vmem>>) attributes {dimension_semantics = [], scalar_prefetch = 0 : i64, scratch_operands = 0 : i64, tpu.core_type = #tpu.core_type<tc>} {
    %c0 = arith.constant 0 : index
    %c0_0 = arith.constant 0 : index
    %0 = vector.load %arg0[%c0, %c0_0] : memref<1x256xf32, #tpu.memory_space<vmem>>, vector<1x256xf32>
    %c0_1 = arith.constant 0 : index
    %c0_2 = arith.constant 0 : index
    %1 = vector.load %arg1[%c0_1, %c0_2] : memref<1x256xf32, #tpu.memory_space<vmem>>, vector<1x256xf32>
    %c0_3 = arith.constant 0 : index
    %c0_4 = arith.constant 0 : index
    %2 = vector.load %arg2[%c0_3, %c0_4] : memref<1x256xf32, #tpu.memory_space<vmem>>, vector<1x256xf32>
    %c0_5 = arith.constant 0 : index
    %c0_6 = arith.constant 0 : index
    %3 = vector.load %arg3[%c0_5, %c0_6] : memref<1x256xf32, #tpu.memory_space<vmem>>, vector<1x256xf32>
    %4 = arith.subf %0, %2 : vector<1x256xf32>
    %5 = arith.subf %1, %3 : vector<1x256xf32>
    %6 = arith.subf %4, %5 : vector<1x256xf32>
    %cst = arith.constant 1.000000e-01 : f32
    %7 = vector.broadcast %cst : f32 to vector<1x256xf32>
    %8 = arith.mulf %7, %6 : vector<1x256xf32>
    %9 = math.absf %8 : vector<1x256xf32>
    %cst_7 = arith.constant 0.000000e+00 : f32
    %10 = vector.broadcast %cst_7 : f32 to vector<1x256xf32>
    %11 = arith.subf %10, %9 : vector<1x256xf32>
    %12 = math.exp %11 : vector<1x256xf32>
    %13 = math.log1p %12 : vector<1x256xf32>
    %cst_8 = arith.constant 0.000000e+00 : f32
    %14 = vector.broadcast %cst_8 : f32 to vector<1x256xf32>
    %15 = arith.minimumf %8, %14 : vector<1x256xf32>
    %16 = arith.subf %13, %15 : vector<1x256xf32>
    %17 = vector.shape_cast %16 : vector<1x256xf32> to vector<1x1x256xf32>
    %cst_9 = arith.constant dense<0.000000e+00> : vector<1xf32>
    %18 = vector.multi_reduction <add>, %17, %cst_9 [1, 2] : vector<1x1x256xf32> to vector<1xf32>
    %19 = vector.shape_cast %18 : vector<1xf32> to vector<1x1x1xf32>
    %20 = vector.extract %19[0, 0, 0] : f32 from vector<1x1x1xf32>
    %21 = vector.shape_cast %4 : vector<1x256xf32> to vector<1x1x256xf32>
    %cst_10 = arith.constant dense<0.000000e+00> : vector<1xf32>
    %22 = vector.multi_reduction <add>, %21, %cst_10 [1, 2] : vector<1x1x256xf32> to vector<1xf32>
    %23 = vector.shape_cast %22 : vector<1xf32> to vector<1x1x1xf32>
    %24 = vector.extract %23[0, 0, 0] : f32 from vector<1x1x1xf32>
    %25 = vector.shape_cast %5 : vector<1x256xf32> to vector<1x1x256xf32>
    %cst_11 = arith.constant dense<0.000000e+00> : vector<1xf32>
    %26 = vector.multi_reduction <add>, %25, %cst_11 [1, 2] : vector<1x1x256xf32> to vector<1xf32>
    %27 = vector.shape_cast %26 : vector<1xf32> to vector<1x1x1xf32>
    %28 = vector.extract %27[0, 0, 0] : f32 from vector<1x1x1xf32>
    %29 = tpu.iota {dimensions = array<i32: 1>} : vector<8x128xi32>
    %c0_i32 = arith.constant 0 : i32
    %30 = vector.broadcast %c0_i32 : i32 to vector<8x128xi32>
    %31 = arith.cmpi eq, %29, %30 : vector<8x128xi32>
    %cst_12 = arith.constant 0.000000e+00 : f32
    %32 = vector.broadcast %20 : f32 to vector<8x128xf32>
    %33 = vector.broadcast %cst_12 : f32 to vector<8x128xf32>
    %34 = arith.select %31, %32, %33 : vector<8x128xi1>, vector<8x128xf32>
    %c1_i32 = arith.constant 1 : i32
    %35 = vector.broadcast %c1_i32 : i32 to vector<8x128xi32>
    %36 = arith.cmpi eq, %29, %35 : vector<8x128xi32>
    %cst_13 = arith.constant 0.000000e+00 : f32
    %37 = vector.broadcast %24 : f32 to vector<8x128xf32>
    %38 = vector.broadcast %cst_13 : f32 to vector<8x128xf32>
    %39 = arith.select %36, %37, %38 : vector<8x128xi1>, vector<8x128xf32>
    %40 = arith.addf %34, %39 : vector<8x128xf32>
    %c2_i32 = arith.constant 2 : i32
    %41 = vector.broadcast %c2_i32 : i32 to vector<8x128xi32>
    %42 = arith.cmpi eq, %29, %41 : vector<8x128xi32>
    %cst_14 = arith.constant 0.000000e+00 : f32
    %43 = vector.broadcast %28 : f32 to vector<8x128xf32>
    %44 = vector.broadcast %cst_14 : f32 to vector<8x128xf32>
    %45 = arith.select %42, %43, %44 : vector<8x128xi1>, vector<8x128xf32>
    %46 = arith.addf %40, %45 : vector<8x128xf32>
    %c0_15 = arith.constant 0 : index
    %c0_16 = arith.constant 0 : index
    %47 = vector.load %arg4[%c0_15, %c0_16] : memref<8x128xf32, #tpu.memory_space<vmem>>, vector<8x128xf32>
    tpu.vector_store %arg4[%c0_15, %c0_16], %46 {strides = array<i32>} : memref<8x128xf32, #tpu.memory_space<vmem>>, vector<8x128xf32>,
    return
  }
}

</mosaic_0001>

<bundles_post_ra>
// kernel: _lambda_.1
= control target key start
LH: loop header
LB: loop body
LE: loop exit
PB: predicated region body
PF: predicated region fallthrough
CT: control target
= control target key end

     0   :  { %v41_v0 = vlaneseq  ;;  %vm51_vm0 = vcmask 1040384   ;;  %s186_s1 = inlined_call_operand.vmem [shape: f32[1,256], index: 1, kind: input, shape index: {}]   ;;  %s187_s3 = inlined_call_operand.vmem [shape: f32[1,256], index: 3, kind: input, shape index: {}]   ;;  %s188_s0 = inlined_call_operand.vmem [shape: f32[1,256], index: 0, kind: input, shape index: {}]   ;;  %s189_s2 = inlined_call_operand.vmem [shape: f32[1,256], index: 2, kind: input, shape index: {}]   ;;  %s190_s4 = inlined_call_operand.vmem [shape: f32[8,128], index: 4, kind: output, shape index: {}]  }
   0x1   :  { %v18_v1 = vld [vmem:[%s186_s1] sm:$0x3] }
   0x2   :  { %v20_v2 = vld [vmem:[%s187_s3] sm:$0x3]  ;;  %v42_v5 = vshrl.u32 %v41_v0, 7  ;;  %v111_v62 = vand.u32 127, %v41_v0 }
   0x3   :  { %v17_v3 = vld [vmem:[%s188_s0] sm:$0x3]  ;;  %v22_v4 = vsub.f32 %v18_v1, %v20_v2 }
   0x4   :  { %v19_v6 = vld [vmem:[%s189_s2] sm:$0x3]  ;;  %v43_v8 = vsub.s32 0, %v42_v5  ;;  %v47_v9 = vsub.s32 1, %v42_v5  ;;  %vm112_vm2 = vcmp.eq.s32.totalorder %v111_v62, 0  ;;  %vm115_vm3 = vcmp.eq.s32.totalorder %v111_v62, 1 }
   0x5   :  { %v21_v7 = vsub.f32 %v17_v3, %v19_v6  ;;  %vm119_vm4 = vcmp.eq.s32.totalorder %v111_v62, 2 }
   0x6   :  { %v91_v11 = vrot.slane %v22_v4, %v43_v8  ;;  %v95_v12 = vrot.slane %v22_v4, %v47_v9 }
   0x7   :  { %v23_v10 = vsub.f32 %v21_v7, %v22_v4  ;;  %v68_v31 = vrot.slane %v21_v7, %v43_v8  ;;  %v72_v32 = vrot.slane %v21_v7, %v47_v9 }
   0x8   :  { %v98_v14 = vsel %vm51_vm0, %v91_v11, 0.0  ;;  %v99_v15 = vsel %vm51_vm0, %v95_v12, 0.0 }
   0x9   :  { %v24_v13 = vmul.f32 0.1, %v23_v10  ;;  %v100_v16 = vadd.f32 %v99_v15, %v98_v14  ;;  %v75_v37 = vsel %vm51_vm0, %v68_v31, 0.0  ;;  %v76_v38 = vsel %vm51_vm0, %v72_v32, 0.0 }
   0xa   :  { %v77_v40 = vadd.f32 %v76_v38, %v75_v37 }
   0xb   :  { %v25_v17 = vand.u32 2147483647, %v24_v13  ;;  %101 = vadd.xlane.f32.xlu1 %v100_v16  ;;  %v38_v27 = vmin.f32 %v24_v13, 0.0 }
   0xd   :  { %v26_v18 = vsub.f32 0.0, %v25_v17 }
   0xf   :  { %v27_v19 = vmul.f32 1.442695, %v26_v18 }
  0x11   :  { %134 = vpow2.f32 %v27_v19 }
  0x1b   :  { %v135_v20 = vpop.eup %134 }
  0x1c   :  { %v29_v21 = vadd.f32 1.0, %v135_v20  ;;  %v32_v22 = vmul.f32 -0.5, %v135_v20  ;;  %v35_v24 = vand.u32 2147483647, %v135_v20 }
  0x1e   :  { %136 = vlog2.f32 %v29_v21  ;;  %v33_v23 = vadd.f32 1.0, %v32_v22  ;;  %vm36_vm1 = vcmp.lt.f32.partialorder %v35_v24, 0.0004427343 }
  0x20   :  { %v34_v25 = vmul.f32 %v135_v20, %v33_v23 }
  0x28   :  { %v137_v26 = vpop.eup %136 }
  0x29   :  { %v31_v28 = vmul.f32 0.6931472, %v137_v26 }
  0x2b   :  { %v37_v29 = vsel %vm36_vm1, %v34_v25, %v31_v28 }
  0x2c   :  { %v39_v30 = vsub.f32 %v37_v29, %v38_v27 }
  0x2e   :  { %v44_v33 = vrot.slane %v39_v30, %v43_v8  ;;  %v48_v34 = vrot.slane %v39_v30, %v47_v9 }
  0x30   :  { %v52_v35 = vsel %vm51_vm0, %v44_v33, 0.0  ;;  %v53_v36 = vsel %vm51_vm0, %v48_v34, 0.0 }
  0x31   :  { %v54_v39 = vadd.f32 %v53_v36, %v52_v35 }
  0x33   :  { %55 = vadd.xlane.f32.xlu0 %v54_v39 }
  0x37   :  { %78 = vadd.xlane.f32.xlu0 %v77_v40 }
  0x98   :  { %v102_v41 = vpop.xlane.xlu1 %101 }
  0x99   :  { %v103_v42 = vrot.slane %v102_v41, 4 }
  0x9b   :  { %v104_v43 = vadd.f32 %v103_v42, %v102_v41 }
  0x9d   :  { %v105_v47 = vrot.slane %v104_v43, 2 }
  0x9f   :  { %v106_v53 = vadd.f32 %v105_v47, %v104_v43 }
  0xa1   :  { %v107_v58 = vrot.slane %v106_v53, 1 }
  0xa3   :  { %v108_v61 = vadd.f32 %v107_v58, %v106_v53 }
  0xc0   :  { %v56_v44 = vpop.xlane.xlu0 %55 }
  0xc1   :  { %v57_v45 = vrot.slane %v56_v44, 4 }
  0xc3   :  { %v58_v46 = vadd.f32 %v57_v45, %v56_v44 }
  0xc4   :  { %v79_v48 = vpop.xlane.xlu0 %78 }
  0xc5   :  { %v59_v49 = vrot.slane %v58_v46, 2  ;;  %v80_v50 = vrot.slane %v79_v48, 4 }
  0xc7   :  { %v81_v51 = vadd.f32 %v80_v50, %v79_v48  ;;  %v60_v52 = vadd.f32 %v59_v49, %v58_v46 }
  0xc9   :  { %v82_v54 = vrot.slane %v81_v51, 2  ;;  %v61_v55 = vrot.slane %v60_v52, 1 }
  0xcb   :  { %v83_v56 = vadd.f32 %v82_v54, %v81_v51  ;;  %v62_v57 = vadd.f32 %v61_v55, %v60_v52 }
  0xcd   :  { %128 = vpush %v62_v57  ;;  %v84_v59 = vrot.slane %v83_v56, 1 }
  0xcf   :  { %v85_v60 = vadd.f32 %v84_v59, %v83_v56 }
  0xd1   :  { %130 = vpush %v85_v60 }
  0xd2   :  { %132 = vpush %v108_v61 }
  0xfe   :  { %s129_s0 = spop %128 }
  0xff   :  { %v113_v63 = vstv %s129_s0 }
 0x100   :  { %v114_v2 = vsel %vm112_vm2, %v113_v63, 0.0 }
 0x102   :  { %s131_s1 = spop %130 }
 0x103   :  { %v116_v1 = vstv %s131_s1  ;;  %s133_s2 = spop %132 }
 0x104   :  { %v117_v3 = vsel %vm115_vm3, %v116_v1, 0.0  ;;  %v120_v4 = vstv %s133_s2 }
 0x105   :  { %v118_v5 = vadd.f32 %v117_v3, %v114_v2  ;;  %v121_v6 = vsel %vm119_vm4, %v120_v4, 0.0 }
 0x107   :  { %v122_v7 = vadd.f32 %v121_v6, %v118_v5 }
 0x109   :  { %123 = vst [vmem:[%s190_s4] sm:$0xff] %v122_v7 }

</bundles_post_ra>
